<compile_context>
chip_gen: v7x
topology: tpu7x:2x2x1
jax: 0.10.0
libtpu: 0.0.40
codegen_flags: <defaults>
</compile_context>

<pallas_src>
import functools

import jax
import jax.numpy as jnp
from jax import lax
from jax.experimental import pallas as pl
from jax.experimental.pallas import tpu as pltpu

_TARGET_GRID_STEPS = 8          # >= ~4 pipelined steps per TensorCore on v7x
_MIN_BLOCK_BYTES = 1 << 20      # keep per-input-block HBM traffic >= ~1 MiB


def _round_up(x, m):
    return ((x + m - 1) // m) * m


def _tpu_vmem_capacity_bytes():
    """Physical VMEM per TensorCore (128 MiB on v5e/v6e, 64 MiB on v7x)."""
    try:
        cap = getattr(pltpu.get_tpu_info(), "vmem_capacity_bytes", None)
        if cap:
            return int(cap)
    except Exception:
        pass
    return 64 * 1024 * 1024     # conservative fallback (v7x-sized, safe everywhere)


# --------------------------------------------------------------------------
# Kernels
# --------------------------------------------------------------------------
def _euclid_lanes_kernel(i_ref, j_ref, o_ref):
    """Rows-on-lanes layout (H < 128): blocks are (H, lane_tile)."""
    a = i_ref[...].astype(jnp.float32)
    b = j_ref[...].astype(jnp.float32)
    # sigmoid(a) - sigmoid(b) == 0.5 * (tanh(a/2) - tanh(b/2)); 0.5 is folded
    # into the final sqrt. One EUP op per element instead of exp + divide.
    d = jnp.tanh(a * 0.5) - jnp.tanh(b * 0.5)
    ssq = jnp.sum(d * d, axis=0, keepdims=True)            # (1, lane_tile), XLU reduce
    o_ref[...] = (0.5 * jnp.sqrt(ssq)).astype(o_ref.dtype)  # lane-dense store


def _euclid_rows_kernel(i_ref, j_ref, o_ref, acc_ref, *, h_total, h_tile):
    """Rows-on-sublanes layout (H >= 128), optionally tiled over H (grid axis 1)."""
    k = pl.program_id(1)

    @pl.when(k == 0)
    def _init():
        acc_ref[...] = jnp.zeros_like(acc_ref)

    a = i_ref[...].astype(jnp.float32)
    b = j_ref[...].astype(jnp.float32)
    d = jnp.tanh(a * 0.5) - jnp.tanh(b * 0.5)
    if h_total % h_tile:
        # H is tiled unevenly: stale lanes of the partial tail H-block must not
        # pollute the accumulator (full blocks pass the mask trivially).
        col = lax.broadcasted_iota(jnp.int32, d.shape, 1)
        d = jnp.where(k * h_tile + col < h_total, d, 0.0)
    acc_ref[...] += jnp.sum(d * d, axis=-1, keepdims=True)   # (row_tile, 1) f32

    @pl.when(k == pl.num_programs(1) - 1)
    def _finalize():
        # Sublane -> lane transpose (XLU is idle here) so the store is a
        # lane-dense (1, row_tile) block instead of row_tile masked vst.msk.
        o_ref[...] = (0.5 * jnp.sqrt(acc_ref[...])).T.astype(o_ref.dtype)


# --------------------------------------------------------------------------
# Tile planning
# --------------------------------------------------------------------------
def _choose_lane_tile(R, H, in_itemsize, out_itemsize, budget):
    """Lane tile for the rows-on-lanes layout (blocks (H, lane_tile))."""
    h_pad = _round_up(max(H, 1), 8)                       # sublane padding in VMEM
    per_lane = 4 * h_pad * in_itemsize + 2 * 8 * out_itemsize
    budget_lanes = max(128, (budget // per_lane) // 128 * 128)
    steps_lanes = _round_up(pl.cdiv(R, _TARGET_GRID_STEPS), 128)
    minbytes_lanes = _round_up(
        pl.cdiv(_MIN_BLOCK_BYTES, max(1, h_pad * in_itemsize)), 128)
    lane_tile = min(budget_lanes, max(steps_lanes, minbytes_lanes))
    if lane_tile >= R:
        return R          # single full-extent block (always a legal block shape)
    return lane_tile      # multiple of 128; tail block is masked by Pallas


def _plan_row_tiles(R, H, in_itemsize, out_itemsize, budget):
    """(row_tile, h_tile) for the rows-on-sublanes layout (blocks (row_tile, h_tile))."""
    h_pad = _round_up(H, 128)
    row_gran = 128        # multiple of every sublane pack (8/16/32) and keeps
                          # the lane-dense output block a full 128-lane store.

    def per_row(h_pad_tile):
        # 2 inputs x 2 pipeline buffers + f32 accumulator column (lane-padded
        # to 128) + 2 output buffers (sublane-padded to 8).
        return 4 * h_pad_tile * in_itemsize + 4 * 128 + 2 * 8 * out_itemsize

    min_rows = _round_up(min(R, row_gran), 8)
    if min_rows * per_row(h_pad) <= budget:
        # Whole H fits per block: single-pass reduce, tile rows only.
        h_tile = H
        budget_rows = max(row_gran,
                          (budget // per_row(h_pad)) // row_gran * row_gran)
        steps_rows = _round_up(pl.cdiv(R, _TARGET_GRID_STEPS), row_gran)
        minbytes_rows = _round_up(
            pl.cdiv(_MIN_BLOCK_BYTES, max(1, h_pad * in_itemsize)), row_gran)
        row_tile = min(budget_rows, max(steps_rows, minbytes_rows))
    else:
        # H itself blows the budget: tile H too and accumulate in VMEM scratch.
        row_tile = row_gran
        rows = min(R, row_tile)
        rem = max(0, budget - rows * (4 * 128 + 2 * 8 * out_itemsize))
        h_tile = (rem // (4 * rows * in_itemsize)) // 128 * 128
        h_tile = max(128, h_tile)
        if h_tile >= H:
            h_tile = H
    if row_tile >= R:
        row_tile = R
    return row_tile, h_tile


# --------------------------------------------------------------------------
# Wrapper
# --------------------------------------------------------------------------
def euclidean_distance(i, j, *, vmem_budget_bytes=None):
    assert i.shape == j.shape, "inputs must have identical shapes"
    lead_shape = i.shape[:-1]
    H = i.shape[-1]
    R = 1
    for s in lead_shape:
        R *= s
    out_dtype = jnp.result_type(i.dtype, j.dtype)
    if R == 0 or H == 0:
        return jnp.zeros(lead_shape, out_dtype)

    cap = _tpu_vmem_capacity_bytes()
    if vmem_budget_bytes is None:
        # Generation-aware: ~40% of physical VMEM for our double-buffered blocks.
        vmem_budget_bytes = max(8 << 20, int(cap * 0.40))
    vmem_limit = int(cap * 0.85)   # raise the scoped limit, leave Mosaic headroom

    in_itemsize = max(jnp.dtype(i.dtype).itemsize, jnp.dtype(j.dtype).itemsize)
    out_itemsize = jnp.dtype(out_dtype).itemsize

    i2 = i.reshape(R, H)
    j2 = j.reshape(R, H)

    if H < 128:
        # ---------------- rows-on-lanes layout (small H, e.g. the module's 32) ----
        i_t = i2.T     # (H, R): rows ride the lane axis (layout plumbing only)
        j_t = j2.T
        lane_tile = _choose_lane_tile(R, H, in_itemsize, out_itemsize,
                                      vmem_budget_bytes)
        out = pl.pallas_call(
            _euclid_lanes_kernel,
            out_shape=jax.ShapeDtypeStruct((1, R), out_dtype),
            grid_spec=pltpu.PrefetchScalarGridSpec(
                num_scalar_prefetch=0,
                grid=(pl.cdiv(R, lane_tile),),
                in_specs=[
                    pl.BlockSpec((H, lane_tile), lambda c: (0, c)),
                    pl.BlockSpec((H, lane_tile), lambda c: (0, c)),
                ],
                out_specs=pl.BlockSpec((1, lane_tile), lambda c: (0, c)),
            ),
            compiler_params=pltpu.CompilerParams(
                dimension_semantics=("parallel",),
                vmem_limit_bytes=vmem_limit,
            ),
        )(i_t, j_t)
        return out.reshape(lead_shape)

    # ---------------- rows-on-sublanes layout (H >= 128) --------------------------
    row_tile, h_tile = _plan_row_tiles(R, H, in_itemsize, out_itemsize,
                                       vmem_budget_bytes)
    n_row_blocks = pl.cdiv(R, row_tile)
    n_h_blocks = pl.cdiv(H, h_tile)
    kernel = functools.partial(_euclid_rows_kernel, h_total=H, h_tile=h_tile)
    out = pl.pallas_call(
        kernel,
        out_shape=jax.ShapeDtypeStruct((1, n_row_blocks * row_tile), out_dtype),
        grid_spec=pltpu.PrefetchScalarGridSpec(
            num_scalar_prefetch=0,
            grid=(n_row_blocks, n_h_blocks),        # reduction (H) axis last
            in_specs=[
                pl.BlockSpec((row_tile, h_tile), lambda r, k: (r, k)),
                pl.BlockSpec((row_tile, h_tile), lambda r, k: (r, k)),
            ],
            out_specs=pl.BlockSpec((1, row_tile), lambda r, k: (0, r)),
            scratch_shapes=[pltpu.VMEM((row_tile, 1), jnp.float32)],
        ),
        compiler_params=pltpu.CompilerParams(
            dimension_semantics=("parallel", "arbitrary"),
            vmem_limit_bytes=vmem_limit,
        ),
    )(i2, j2)
    # Drop garbage tail rows (stale VMEM rows of a partial last row block are
    # computed but meaningless) and restore the leading shape.
    return out.reshape(-1)[:R].reshape(lead_shape)


def _reference(i, j):
    i_n = jax.nn.sigmoid(i.astype(jnp.float32))
    j_n = jax.nn.sigmoid(j.astype(jnp.float32))
    return jnp.sqrt(jnp.sum((i_n - j_n) ** 2, axis=-1))


if __name__ == "__main__":
    key = jax.random.PRNGKey(0)
    ks = jax.random.split(key, 6)

    # Primary: small shape consistent with the module: (batch, seq, hidden).
    batch, seq, hidden = 2, 8, 32
    i1 = jax.random.normal(ks[0], (batch, seq, hidden), dtype=jnp.float32)
    j1 = jax.random.normal(ks[1], (batch, seq, hidden), dtype=jnp.float32)
    out1 = jax.block_until_ready(euclidean_distance(i1, j1))
    ref1 = _reference(i1, j1)
    assert out1.shape == ref1.shape == (batch, seq)
    # tanh-based sigmoid differs from the exp-based reference at the ~ulp level.
    assert jnp.allclose(out1, ref1, atol=1e-4, rtol=1e-4), "mismatch (rows-on-lanes)"

    # Also exercise the H >= 128 (rows-on-sublanes, lane-dense store) path.
    i2 = jax.random.normal(ks[2], (3, 17, 256), dtype=jnp.float32)
    j2 = jax.random.normal(ks[3], (3, 17, 256), dtype=jnp.float32)
    out2 = jax.block_until_ready(euclidean_distance(i2, j2))
    assert jnp.allclose(out2, _reference(i2, j2), atol=1e-4, rtol=1e-4), \
        "mismatch (rows-on-sublanes)"

    # Force the H-tiled accumulator + tail-mask path with a tiny VMEM budget.
    i3 = jax.random.normal(ks[4], (16, 576), dtype=jnp.float32)
    j3 = jax.random.normal(ks[5], (16, 576), dtype=jnp.float32)
    out3 = jax.block_until_ready(
        euclidean_distance(i3, j3, vmem_budget_bytes=64 * 1024))
    assert jnp.allclose(out3, _reference(i3, j3), atol=1e-4, rtol=1e-4), \
        "mismatch (H-tiled accumulator)"

    print("KERNEL_OK")
</pallas_src>

<mosaic_0001>
module attributes {stable_mosaic.version = 11 : i64} {
  func.func @_euclid_lanes_kernel(%arg0: i32, %arg1: memref<32x16xf32, #tpu.memory_space<vmem>>, %arg2: memref<32x16xf32, #tpu.memory_space<vmem>>, %arg3: memref<1x16xf32, #tpu.memory_space<vmem>>) attributes {dimension_semantics = [#tpu.dimension_semantics<parallel>], iteration_bounds = array<i64: 1>, scalar_prefetch = 0 : i64, scratch_operands = 0 : i64, tpu.core_type = #tpu.core_type<tc>, window_params = [{transform_indices = @transform_0, window_bounds = array<i64: 32, 16>}, {transform_indices = @transform_1, window_bounds = array<i64: 32, 16>}, {transform_indices = @transform_2, window_bounds = array<i64: 1, 16>}]} {
    %c0 = arith.constant 0 : index
    %c0_0 = arith.constant 0 : index
    %0 = vector.load %arg1[%c0, %c0_0] : memref<32x16xf32, #tpu.memory_space<vmem>>, vector<32x16xf32>
    %c0_1 = arith.constant 0 : index
    %c0_2 = arith.constant 0 : index
    %1 = vector.load %arg2[%c0_1, %c0_2] : memref<32x16xf32, #tpu.memory_space<vmem>>, vector<32x16xf32>
    %cst = arith.constant 5.000000e-01 : f32
    %2 = vector.broadcast %cst : f32 to vector<32x16xf32>
    %3 = arith.mulf %0, %2 : vector<32x16xf32>
    %4 = math.tanh %3 : vector<32x16xf32>
    %cst_3 = arith.constant 5.000000e-01 : f32
    %5 = vector.broadcast %cst_3 : f32 to vector<32x16xf32>
    %6 = arith.mulf %1, %5 : vector<32x16xf32>
    %7 = math.tanh %6 : vector<32x16xf32>
    %8 = arith.subf %4, %7 : vector<32x16xf32>
    %9 = arith.mulf %8, %8 : vector<32x16xf32>
    %cst_4 = arith.constant dense<0.000000e+00> : vector<16xf32>
    %10 = vector.multi_reduction <add>, %9, %cst_4 [0] : vector<32x16xf32> to vector<16xf32>
    %11 = vector.shape_cast %10 : vector<16xf32> to vector<1x16xf32>
    %12 = math.sqrt %11 : vector<1x16xf32>
    %cst_5 = arith.constant 5.000000e-01 : f32
    %13 = vector.broadcast %cst_5 : f32 to vector<1x16xf32>
    %14 = arith.mulf %13, %12 : vector<1x16xf32>
    %c0_6 = arith.constant 0 : index
    %c0_7 = arith.constant 0 : index
    %15 = vector.load %arg3[%c0_6, %c0_7] : memref<1x16xf32, #tpu.memory_space<vmem>>, vector<1x16xf32>
    tpu.vector_store %arg3[%c0_6, %c0_7], %14 {strides = array<i32>} : memref<1x16xf32, #tpu.memory_space<vmem>>, vector<1x16xf32>,
    return
  }
  func.func @transform_0(%arg0: i32) -> (i32, i32) {
    %c0_i32 = arith.constant 0 : i32
    %c0_i32_0 = arith.constant 0 : i32
    return %c0_i32, %arg0 : i32, i32
  }
  func.func @transform_1(%arg0: i32) -> (i32, i32) {
    %c0_i32 = arith.constant 0 : i32
    %c0_i32_0 = arith.constant 0 : i32
    return %c0_i32, %arg0 : i32, i32
  }
  func.func @transform_2(%arg0: i32) -> (i32, i32) {
    %c0_i32 = arith.constant 0 : i32
    %c0_i32_0 = arith.constant 0 : i32
    return %c0_i32, %arg0 : i32, i32
  }
}

</mosaic_0001>

<bundles_post_ra>
// kernel: tpu_custom_call.1
= control target key start
LH: loop header
LB: loop body
LE: loop exit
PB: predicated region body
PF: predicated region fallthrough
CT: control target
= control target key end

     0   :  { %s177_s0 = inlined_call_operand.vmem [shape: f32[32,16], index: 0, kind: input, shape index: {}]   ;;  %s178_s1 = inlined_call_operand.vmem [shape: f32[32,16], index: 1, kind: input, shape index: {}]   ;;  %s179_s2 = inlined_call_operand.hbm [shape: f32[1,16], index: 2, kind: output, shape index: {}]  }
   0x1   :  { %v12_v0 = vld [vmem:[%s177_s0] sm:$0xff]  ;;  %v13_v1 = vld [vmem:[%s177_s0 + $0x8] sm:$0xff]  ;;  %v14_v2 = vld [vmem:[%s177_s0 + $0x10] sm:$0xff] }
   0x2   :  { %v15_v3 = vld [vmem:[%s177_s0 + $0x18] sm:$0xff]  ;;  %v16_v4 = vld [vmem:[%s178_s1] sm:$0xff]  ;;  %v17_v5 = vld [vmem:[%s178_s1 + $0x8] sm:$0xff]  ;;  %v20_v6 = vmul.f32 0.5, %v12_v0  ;;  %v21_v7 = vmul.f32 0.5, %v13_v1  ;;  %v22_v8 = vmul.f32 0.5, %v14_v2 }
   0x3   :  { %v18_v9 = vld [vmem:[%s178_s1 + $0x10] sm:$0xff]  ;;  %v23_v10 = vmul.f32 0.5, %v15_v3  ;;  %v19_v11 = vld [vmem:[%s178_s1 + $0x18] sm:$0xff]  ;;  %v28_v12 = vmul.f32 0.5, %v16_v4 }
   0x4   :  { %83 = vtanh.f32 %v20_v6 }
   0x5   :  { %7 = vsyncpa [#allocation3], 0  ;;  %85 = vtanh.f32 %v21_v7  ;;  %v29_v13 = vmul.f32 0.5, %v17_v5  ;;  %v30_v14 = vmul.f32 0.5, %v18_v9  ;;  %v31_v15 = vmul.f32 0.5, %v19_v11  ;;  %s125_s0 = smov [#allocation2]  }
   0x6   :  { %87 = vtanh.f32 %v22_v8  ;;  %vm44_vm0 = vcmask 130048   ;;  %s74_s1 = sshll.u32 %s125_s0, 4  ;;  %vm66_vm3 = vcmask 122880   ;;  %s75_s1 = int_to_ptr.vmem [resolvable:$true] %s74_s1 }
   0x7   :  { %89 = vtanh.f32 %v23_v10  ;;  %s101_s25 = scalar_lea.vmem %s75_s1, 16  ;;  %s105_s26 = scalar_lea.vmem %s75_s1, 32 }
   0x8   :  { %91 = vtanh.f32 %v28_v12  ;;  %p102_p0 = scmp.ne.s32.totalorder %s75_s1, %s101_s25  ;;  %p106_p1 = scmp.lt.s32.totalorder %s75_s1, %s75_s1 }
   0x9   :  { %93 = vtanh.f32 %v29_v13  ;;  %p107_p2 = scmp.lt.s32.totalorder %s105_s26, %s101_s25 }
   0xa   :  { %95 = vtanh.f32 %v30_v14 }
   0xb   :  { %97 = vtanh.f32 %v31_v15  ;;  %p108_p3 = por %p107_p2, %p106_p1 }
   0xd   :  { %p109_p4 = pnand %p108_p3, %p102_p0 }
   0xe   :  { %v84_v16 = vpop.eup %83 }
   0xf   :  { %v86_v17 = vpop.eup %85 }
  0x10   :  { %v88_v18 = vpop.eup %87 }
  0x11   :  { %v90_v19 = vpop.eup %89 }
  0x12   :  { %v92_v20 = vpop.eup %91 }
  0x13   :  { %v94_v21 = vpop.eup %93  ;;  %v36_v22 = vsub.f32 %v84_v16, %v92_v20 }
  0x14   :  { %v96_v23 = vpop.eup %95  ;;  %v37_v24 = vsub.f32 %v86_v17, %v94_v21 }
  0x15   :  { %v98_v25 = vpop.eup %97  ;;  %v38_v26 = vsub.f32 %v88_v18, %v96_v23  ;;  %v40_v27 = vmul.f32 %v36_v22, %v36_v22 }
  0x16   :  { %v39_v28 = vsub.f32 %v90_v19, %v98_v25  ;;  %v41_v29 = vmul.f32 %v37_v24, %v37_v24 }
  0x17   :  { %v42_v30 = vmul.f32 %v38_v26, %v38_v26  ;;  %v45_v31 = vsel %vm44_vm0, %v40_v27, 0.0 }
  0x18   :  { %v43_v32 = vmul.f32 %v39_v28, %v39_v28  ;;  %v46_v33 = vsel %vm44_vm0, %v41_v29, 0.0 }
  0x19   :  { %v47_v34 = vadd.f32 %v46_v33, %v45_v31  ;;  %v48_v35 = vsel %vm44_vm0, %v42_v30, 0.0 }
  0x1a   :  { %v50_v36 = vsel %vm44_vm0, %v43_v32, 0.0 }
  0x1b   :  { %v49_v37 = vadd.f32 %v48_v35, %v47_v34 }
  0x1d   :  { %v51_v38 = vadd.f32 %v50_v36, %v49_v37 }
  0x1f   :  { %v52_v39 = vrot.slane %v51_v38, 4 }
  0x21   :  { %v53_v40 = vadd.f32 %v52_v39, %v51_v38 }
  0x23   :  { %v54_v41 = vrot.slane %v53_v40, 2 }
  0x25   :  { %v55_v42 = vadd.f32 %v54_v41, %v53_v40 }
  0x27   :  { %v56_v43 = vrot.slane %v55_v42, 1 }
  0x29   :  { %v57_v44 = vadd.f32 %v56_v43, %v55_v42 }
  0x2b   :  { %99 = vrsqrt.f32 %v57_v44  ;;  %vm60_vm1 = vcmp.eq.f32.partialorder %v57_v44, inf  ;;  %v63_v46 = vand.u32 2147483648, %v57_v44  ;;  %vm62_vm2 = vcmp.eq.f32.partialorder %v57_v44, 0.0 }
  0x35   :  { %v100_v45 = vpop.eup %99 }
  0x36   :  { %v59_v47 = vmul.f32 %v100_v45, %v57_v44 }
  0x38   :  { %v61_v48 = vsel %vm60_vm1, %v57_v44, %v59_v47 }
  0x39   :  { %v64_v49 = vsel %vm62_vm2, %v63_v46, %v61_v48 }
  0x3a   :  { %v65_v50 = vmul.f32 0.5, %v64_v49 }
  0x3c   :  { %67 = vst.msk [vmem:[#allocation2] sm:$0x1] %vm66_vm3, %v65_v50 }
  0x3d   :  { %112 = shalt.err (!%p109_p4)
}
  0x3e   :  { %s113_s29 = scalar_lea.hbm %s179_s2, 16 }
  0x3f   :  { %p114_p5 = scmp.ne.s32.totalorder %s179_s2, %s113_s29  ;;  %p117_p6 = scmp.lt.u32.totalorder %s113_s29, %s179_s2 }
  0x41   :  { %p119_p7 = pnand %p117_p6, %p114_p5 }
  0x43   :  { %122 = shalt.err (!%p119_p7)
}
  0x44   :  { %77 = dma.vmem_to_hbm [thread:$0]  %s75_s1, 16, %s179_s2, [#allocation3]  }
  0x45   :  { %123 = dma.done.wait [#allocation3], 16  }
  0x46   :  { %124 = vsyncadd [#allocation3], 4294967280 }
  0x47   :  { %81 = vsyncpa [#allocation3], 1 }

</bundles_post_ra>
